<compile_context>
chip_gen: v7x
topology: tpu7x:2x2x1
jax: 0.10.0
libtpu: 0.0.40
codegen_flags: <defaults>
</compile_context>

<pallas_src>
import functools

import jax
import jax.numpy as jnp
from jax.experimental import pallas as pl
from jax.experimental.pallas import tpu as pltpu


# ----------------------------------------------------------------------------
# Kernels
# ----------------------------------------------------------------------------
def _policy_kernel_rowmajor(x_ref, w1_ref, b1_ref, w2_ref, b2_ref, o_ref,
                            *, matmul_dtype):
    """Batch on sublanes: x (TB, S) -> probs (TB, A)."""
    x = x_ref[...]                                               # (TB, S) f32
    # Hidden layer: Linear + ReLU (MXU in matmul_dtype, f32 accumulation).
    h = jnp.dot(x.astype(matmul_dtype), w1_ref[...].astype(matmul_dtype),
                preferred_element_type=jnp.float32)              # (TB, Hp)
    h = jnp.maximum(h + b1_ref[...], 0.0)
    # Output layer: Linear.
    logits = jnp.dot(h.astype(matmul_dtype), w2_ref[...].astype(matmul_dtype),
                     preferred_element_type=jnp.float32)         # (TB, A)
    logits = logits + b2_ref[...]
    # Numerically-stable softmax over the last dim.
    m = jnp.max(logits, axis=-1, keepdims=True)
    e = jnp.exp(logits - m)
    inv = pl.reciprocal(jnp.sum(e, axis=-1, keepdims=True), approx=True)
    o_ref[...] = (e * inv).astype(o_ref.dtype)


def _policy_kernel_lanedense(xt_ref, w1t_ref, b1t_ref, w2t_ref, b2t_ref, o_ref,
                             *, matmul_dtype):
    """Batch on lanes: x^T (S, TB) -> probs^T (A, TB); all stores lane-dense."""
    xt = xt_ref[...]                                             # (S, TB) f32
    ht = jnp.dot(w1t_ref[...].astype(matmul_dtype), xt.astype(matmul_dtype),
                 preferred_element_type=jnp.float32)             # (Hp, TB)
    ht = jnp.maximum(ht + b1t_ref[...], 0.0)                     # + (Hp, 1)
    lt = jnp.dot(w2t_ref[...].astype(matmul_dtype), ht.astype(matmul_dtype),
                 preferred_element_type=jnp.float32)             # (A, TB)
    lt = lt + b2t_ref[...]                                       # + (A, 1)
    # Softmax over the action (sublane) axis.
    m = jnp.max(lt, axis=0, keepdims=True)                       # (1, TB)
    e = jnp.exp(lt - m)
    inv = pl.reciprocal(jnp.sum(e, axis=0, keepdims=True), approx=True)
    o_ref[...] = (e * inv).astype(o_ref.dtype)


# ----------------------------------------------------------------------------
# Wrappers
# ----------------------------------------------------------------------------
def _pad_hidden(w1, b1, w2):
    """Zero-pad the hidden dim (30) up to a sublane multiple (32). Bit-exact."""
    h = w1.shape[1]
    hp = ((h + 7) // 8) * 8
    if hp == h:
        return w1, b1, w2
    pad = hp - h
    return (jnp.pad(w1, ((0, 0), (0, pad))),
            jnp.pad(b1, ((0, 0), (0, pad))),
            jnp.pad(w2, ((0, pad), (0, 0))))


def policy_network_forward(x, w1, b1, w2, b2, *,
                           matmul_dtype=jnp.float32, block_batch=512):
    """x: (B, state_dim) f32. Returns softmax probs (B, action_dim) f32."""
    B, S = x.shape
    A = w2.shape[1]
    w1p, b1p, w2p = _pad_hidden(w1, b1.reshape(1, -1), w2)
    Hp = w1p.shape[1]
    b2r = b2.reshape(1, -1)

    # Batch tile: big (512+) to amortize per-step overhead; round tiny batches
    # up to a sublane multiple. Pad B so every grid block is full (no ragged).
    TB = block_batch if B >= block_batch else max(8, ((B + 7) // 8) * 8)
    Bp = ((B + TB - 1) // TB) * TB
    xp = jnp.pad(x, ((0, Bp - B), (0, 0))) if Bp != B else x

    kernel = functools.partial(_policy_kernel_rowmajor, matmul_dtype=matmul_dtype)
    out = pl.pallas_call(
        kernel,
        out_shape=jax.ShapeDtypeStruct((Bp, A), jnp.float32),
        grid=(Bp // TB,),
        in_specs=[
            pl.BlockSpec((TB, S), lambda i: (i, 0)),   # x: streamed per batch tile
            pl.BlockSpec((S, Hp), lambda i: (0, 0)),   # weights/biases: resident
            pl.BlockSpec((1, Hp), lambda i: (0, 0)),
            pl.BlockSpec((Hp, A), lambda i: (0, 0)),
            pl.BlockSpec((1, A), lambda i: (0, 0)),
        ],
        out_specs=pl.BlockSpec((TB, A), lambda i: (i, 0)),
        compiler_params=pltpu.CompilerParams(dimension_semantics=("parallel",)),
    )(xp, w1p, b1p, w2p, b2r)
    return out[:B]


def policy_network_forward_lanedense(x, w1, b1, w2, b2, *,
                                     matmul_dtype=jnp.float32, block_batch=2048):
    """Lane-dense variant for large B: batch rides the 128-lane axis so output
    stores are unmasked. Wrapper transposes x / result (layout plumbing)."""
    B, S = x.shape
    A = w2.shape[1]
    w1p, b1p, w2p = _pad_hidden(w1, b1.reshape(1, -1), w2)
    Hp = w1p.shape[1]

    TB = block_batch if B >= block_batch else max(128, ((B + 127) // 128) * 128)
    Bp = ((B + TB - 1) // TB) * TB
    xt = jnp.pad(x, ((0, Bp - B), (0, 0))).T           # (S, Bp)
    w1t, b1t = w1p.T, b1p.T                            # (Hp, S), (Hp, 1)
    w2t, b2t = w2p.T, b2.reshape(1, -1).T              # (A, Hp), (A, 1)

    kernel = functools.partial(_policy_kernel_lanedense, matmul_dtype=matmul_dtype)
    out_t = pl.pallas_call(
        kernel,
        out_shape=jax.ShapeDtypeStruct((A, Bp), jnp.float32),
        grid=(Bp // TB,),
        in_specs=[
            pl.BlockSpec((S, TB), lambda i: (0, i)),
            pl.BlockSpec((Hp, S), lambda i: (0, 0)),
            pl.BlockSpec((Hp, 1), lambda i: (0, 0)),
            pl.BlockSpec((A, Hp), lambda i: (0, 0)),
            pl.BlockSpec((A, 1), lambda i: (0, 0)),
        ],
        out_specs=pl.BlockSpec((A, TB), lambda i: (0, i)),
        compiler_params=pltpu.CompilerParams(dimension_semantics=("parallel",)),
    )(xt, w1t, b1t, w2t, b2t)
    return out_t[:, :B].T


# ----------------------------------------------------------------------------
# Parameter init (mimics PyTorch nn.Linear default U[-1/sqrt(fan_in), +..])
# ----------------------------------------------------------------------------
def init_params(key, state_dim, action_dim, hidden=30):
    k1, k2, k3, k4 = jax.random.split(key, 4)
    lim1 = 1.0 / jnp.sqrt(state_dim)
    lim2 = 1.0 / jnp.sqrt(hidden)
    w1 = jax.random.uniform(k1, (state_dim, hidden), jnp.float32, -lim1, lim1)
    b1 = jax.random.uniform(k2, (1, hidden), jnp.float32, -lim1, lim1)
    w2 = jax.random.uniform(k3, (hidden, action_dim), jnp.float32, -lim2, lim2)
    b2 = jax.random.uniform(k4, (1, action_dim), jnp.float32, -lim2, lim2)
    return w1, b1, w2, b2


if __name__ == "__main__":
    state_dim, action_dim, batch = 32, 8, 2
    key = jax.random.PRNGKey(0)
    kx, kp, kb = jax.random.split(key, 3)
    x = jax.random.normal(kx, (batch, state_dim), jnp.float32)
    w1, b1, w2, b2 = init_params(kp, state_dim, action_dim)

    def ref_fwd(xv):
        h = jnp.maximum(xv @ w1 + b1, 0.0)
        return jax.nn.softmax(h @ w2 + b2, axis=-1)

    # 1) Row-major f32 kernel, tiny batch (matches PyTorch layout/semantics).
    out = jax.block_until_ready(policy_network_forward(x, w1, b1, w2, b2))
    assert out.shape == (batch, action_dim)
    assert jnp.allclose(out, ref_fwd(x), atol=5e-3), "rowmajor small-batch mismatch"
    assert jnp.allclose(jnp.sum(out, axis=-1), 1.0, atol=5e-3)

    # 2) Lane-dense variant (output stored (A, B)-transposed inside the kernel).
    out_ld = jax.block_until_ready(
        policy_network_forward_lanedense(x, w1, b1, w2, b2))
    assert out_ld.shape == (batch, action_dim)
    assert jnp.allclose(out_ld, ref_fwd(x), atol=5e-3), "lane-dense mismatch"

    # 3) Larger, non-tile-multiple batch: exercises the batch grid + padding.
    xb = jax.random.normal(kb, (1000, state_dim), jnp.float32)
    out_big = jax.block_until_ready(policy_network_forward(xb, w1, b1, w2, b2))
    assert out_big.shape == (1000, action_dim)
    assert jnp.allclose(out_big, ref_fwd(xb), atol=5e-3), "gridded batch mismatch"

    # 4) bf16 matmul path (v6e/v7x native MXU dtype); f32 accumulation.
    out_bf = jax.block_until_ready(
        policy_network_forward(xb, w1, b1, w2, b2, matmul_dtype=jnp.bfloat16))
    assert jnp.allclose(out_bf, ref_fwd(xb), atol=2e-2), "bf16 path mismatch"

    print("KERNEL_OK")
</pallas_src>

<mosaic_0001>
module attributes {stable_mosaic.version = 11 : i64} {
  func.func @_policy_kernel_rowmajor(%arg0: i32, %arg1: memref<8x32xf32, #tpu.memory_space<vmem>>, %arg2: memref<32x32xf32, #tpu.memory_space<vmem>>, %arg3: memref<1x32xf32, #tpu.memory_space<vmem>>, %arg4: memref<32x8xf32, #tpu.memory_space<vmem>>, %arg5: memref<1x8xf32, #tpu.memory_space<vmem>>, %arg6: memref<8x8xf32, #tpu.memory_space<vmem>>) attributes {dimension_semantics = [#tpu.dimension_semantics<parallel>], iteration_bounds = array<i64: 1>, scalar_prefetch = 0 : i64, scratch_operands = 0 : i64, tpu.core_type = #tpu.core_type<tc>, window_params = [{transform_indices = @transform_0, window_bounds = array<i64: 8, 32>}, {pipeline_mode = #tpu.pipeline_mode<synchronous>, transform_indices = @transform_1, window_bounds = array<i64: 32, 32>}, {pipeline_mode = #tpu.pipeline_mode<synchronous>, transform_indices = @transform_2, window_bounds = array<i64: 1, 32>}, {pipeline_mode = #tpu.pipeline_mode<synchronous>, transform_indices = @transform_3, window_bounds = array<i64: 32, 8>}, {pipeline_mode = #tpu.pipeline_mode<synchronous>, transform_indices = @transform_4, window_bounds = array<i64: 1, 8>}, {transform_indices = @transform_5, window_bounds = array<i64: 8, 8>}]} {
    %c0 = arith.constant 0 : index
    %c0_0 = arith.constant 0 : index
    %0 = vector.load %arg1[%c0, %c0_0] : memref<8x32xf32, #tpu.memory_space<vmem>>, vector<8x32xf32>
    %c0_1 = arith.constant 0 : index
    %c0_2 = arith.constant 0 : index
    %1 = vector.load %arg2[%c0_1, %c0_2] : memref<32x32xf32, #tpu.memory_space<vmem>>, vector<32x32xf32>
    %cst = arith.constant dense<0.000000e+00> : vector<8x32xf32>
    %2 = tpu.matmul %0, %1, %cst {dimension_numbers = #tpu.dot_dimension_numbers<[1], [0], [0], [1], [0, 0, 1, 1], [], []>} : vector<8x32xf32>, vector<32x32xf32>, vector<8x32xf32> -> vector<8x32xf32>
    %c0_3 = arith.constant 0 : index
    %c0_4 = arith.constant 0 : index
    %3 = vector.load %arg3[%c0_3, %c0_4] : memref<1x32xf32, #tpu.memory_space<vmem>>, vector<1x32xf32>
    %4 = vector.broadcast %3 : vector<1x32xf32> to vector<8x32xf32>
    %5 = arith.addf %2, %4 : vector<8x32xf32>
    %cst_5 = arith.constant 0.000000e+00 : f32
    %6 = vector.broadcast %cst_5 : f32 to vector<8x32xf32>
    %7 = arith.maximumf %5, %6 : vector<8x32xf32>
    %c0_6 = arith.constant 0 : index
    %c0_7 = arith.constant 0 : index
    %8 = vector.load %arg4[%c0_6, %c0_7] : memref<32x8xf32, #tpu.memory_space<vmem>>, vector<32x8xf32>
    %cst_8 = arith.constant dense<0.000000e+00> : vector<8x8xf32>
    %9 = tpu.matmul %7, %8, %cst_8 {dimension_numbers = #tpu.dot_dimension_numbers<[1], [0], [0], [1], [0, 0, 1, 1], [], []>} : vector<8x32xf32>, vector<32x8xf32>, vector<8x8xf32> -> vector<8x8xf32>
    %c0_9 = arith.constant 0 : index
    %c0_10 = arith.constant 0 : index
    %10 = vector.load %arg5[%c0_9, %c0_10] : memref<1x8xf32, #tpu.memory_space<vmem>>, vector<1x8xf32>
    %11 = vector.broadcast %10 : vector<1x8xf32> to vector<8x8xf32>
    %12 = arith.addf %9, %11 : vector<8x8xf32>
    %cst_11 = arith.constant dense<0xFF800000> : vector<8xf32>
    %13 = vector.multi_reduction <maximumf>, %12, %cst_11 [1] : vector<8x8xf32> to vector<8xf32>
    %14 = vector.shape_cast %13 : vector<8xf32> to vector<8x1xf32>
    %15 = vector.broadcast %14 : vector<8x1xf32> to vector<8x8xf32>
    %16 = arith.subf %12, %15 : vector<8x8xf32>
    %17 = math.exp %16 : vector<8x8xf32>
    %cst_12 = arith.constant dense<0.000000e+00> : vector<8xf32>
    %18 = vector.multi_reduction <add>, %17, %cst_12 [1] : vector<8x8xf32> to vector<8xf32>
    %19 = vector.shape_cast %18 : vector<8xf32> to vector<8x1xf32>
    %20 = tpu.reciprocal %19 {approx = true} : vector<8x1xf32> -> vector<8x1xf32>
    %21 = vector.broadcast %20 : vector<8x1xf32> to vector<8x8xf32>
    %22 = arith.mulf %17, %21 : vector<8x8xf32>
    %c0_13 = arith.constant 0 : index
    %c0_14 = arith.constant 0 : index
    %23 = vector.load %arg6[%c0_13, %c0_14] : memref<8x8xf32, #tpu.memory_space<vmem>>, vector<8x8xf32>
    tpu.vector_store %arg6[%c0_13, %c0_14], %22 {strides = array<i32>} : memref<8x8xf32, #tpu.memory_space<vmem>>, vector<8x8xf32>,
    return
  }
  func.func @transform_0(%arg0: i32) -> (i32, i32) {
    %c0_i32 = arith.constant 0 : i32
    %c0_i32_0 = arith.constant 0 : i32
    return %arg0, %c0_i32 : i32, i32
  }
  func.func @transform_1(%arg0: i32) -> (i32, i32) {
    %c0_i32 = arith.constant 0 : i32
    %c0_i32_0 = arith.constant 0 : i32
    %c0_i32_1 = arith.constant 0 : i32
    return %c0_i32, %c0_i32_0 : i32, i32
  }
  func.func @transform_2(%arg0: i32) -> (i32, i32) {
    %c0_i32 = arith.constant 0 : i32
    %c0_i32_0 = arith.constant 0 : i32
    %c0_i32_1 = arith.constant 0 : i32
    return %c0_i32, %c0_i32_0 : i32, i32
  }
  func.func @transform_3(%arg0: i32) -> (i32, i32) {
    %c0_i32 = arith.constant 0 : i32
    %c0_i32_0 = arith.constant 0 : i32
    %c0_i32_1 = arith.constant 0 : i32
    return %c0_i32, %c0_i32_0 : i32, i32
  }
  func.func @transform_4(%arg0: i32) -> (i32, i32) {
    %c0_i32 = arith.constant 0 : i32
    %c0_i32_0 = arith.constant 0 : i32
    %c0_i32_1 = arith.constant 0 : i32
    return %c0_i32, %c0_i32_0 : i32, i32
  }
  func.func @transform_5(%arg0: i32) -> (i32, i32) {
    %c0_i32 = arith.constant 0 : i32
    %c0_i32_0 = arith.constant 0 : i32
    return %arg0, %c0_i32 : i32, i32
  }
}

</mosaic_0001>

<bundles_post_ra>
// kernel: tpu_custom_call.1
= control target key start
LH: loop header
LB: loop body
LE: loop exit
PB: predicated region body
PF: predicated region fallthrough
CT: control target
= control target key end

     0   :  { %v299_v3 = vmov 0.0|0.0   ;;  %vm300_vm0 = vmmov 0   ;;  %v301_v6 = vmov 0.0   ;;  %s381_s0 = inlined_call_operand.vmem [shape: f32[8,32], index: 0, kind: input, shape index: {}]   ;;  %s382_s1 = inlined_call_operand.vmem [shape: f32[32,32], index: 1, kind: input, shape index: {}]   ;;  %s383_s2 = inlined_call_operand.vmem [shape: f32[1,32], index: 2, kind: input, shape index: {}]   ;;  %s384_s3 = inlined_call_operand.vmem [shape: f32[32,8], index: 3, kind: input, shape index: {}]   ;;  %s385_s4 = inlined_call_operand.vmem [shape: f32[1,8], index: 4, kind: input, shape index: {}]   ;;  %s386_s5 = inlined_call_operand.hbm [shape: f32[8,8], index: 5, kind: output, shape index: {}]  }
   0x1   :  { %v22_v0 = vld [vmem:[%s382_s1] sm:$0xff]  ;;  %v23_v1 = vld [vmem:[%s382_s1 + $0x8] sm:$0xff]  ;;  %v24_v2 = vld [vmem:[%s382_s1 + $0x10] sm:$0xff]  ;;  %255 = vmatprep.subr.bf16.mxu0 %v299_v3  ;;  %241 = vmatprep.mubr.msk.f32.mxu0 %vm300_vm0, %v301_v6 }
   0x2   :  { %v256_v4 = vpack.c.bf16 %v23_v1, %v22_v0  ;;  %v25_v5 = vld [vmem:[%s382_s1 + $0x18] sm:$0xff]  ;;  %v108_v7 = vld [vmem:[%s384_s3] sm:$0xff]  ;;  %261 = vmatprep.subr.bf16.mxu1 %v299_v3  ;;  %v109_v8 = vld [vmem:[%s384_s3 + $0x8] sm:$0xff]  ;;  %252 = vmatprep.mubr.msk.f32.mxu1 %vm300_vm0, %v301_v6 }
   0x3   :  { %10 = vsyncpa [#allocation3], 0  ;;  %v259_v9 = vpack.c.bf16 %v25_v5, %v24_v2  ;;  %v262_v10 = vpack.c.bf16 %v109_v8, %v108_v7  ;;  %v21_v11 = vld [vmem:[%s381_s0] sm:$0xff]  ;;  %vm33_vm1 = vcmask 261120   ;;  %v110_v12 = vld [vmem:[%s384_s3 + $0x10] sm:$0xff]  ;;  %vm192_vm2 = vcmask 64512  }
   0x4   :  { %257 = vmatpush3.bf16.msra.mxu0 %v256_v4  ;;  %v111_v13 = vld [vmem:[%s384_s3 + $0x18] sm:$0xff]  ;;  %v219_v15 = vld [vmem:[%s383_s2] ss:$0 sm:$0xff]  ;;  %s302_s2 = smov [#allocation2]  }
   0x5   :  { %258 = vmatprep.subr.bf16.mxu0 %v299_v3  ;;  %263 = vmatpush3.bf16.msra.mxu1 %v262_v10  ;;  %v265_v14 = vpack.c.bf16 %v111_v13, %v110_v12  ;;  %v221_v20 = vld [vmem:[%s385_s4] ss:$0 sm:$0xff]  ;;  %s211_s3 = sshll.u32 %s302_s2, 4  ;;  %s212_s3 = int_to_ptr.vmem [resolvable:$true] %s211_s3 }
   0x6   :  { %264 = vmatprep.subr.bf16.mxu1 %v299_v3  ;;  %s275_s4 = scalar_lea.vmem %s212_s3, 128  ;;  %p280_p1 = scmp.lt.s32.totalorder %s212_s3, %s212_s3 }
   0x7   :  { %p276_p0 = scmp.ne.s32.totalorder %s212_s3, %s275_s4  ;;  %p281_p2 = scmp.lt.s32.totalorder %s275_s4, %s275_s4 }
   0x8   :  { %260 = vmatpush3.bf16.msra.mxu0 %v259_v9 }
   0x9   :  { %266 = vmatpush3.bf16.msra.mxu1 %v265_v14  ;;  %p282_p3 = por %p281_p2, %p280_p1 }
   0xb   :  { %242 = vmatmul.mubr.msk.f32.vlgmr.msra.gmra.mrb[0].mxu0 %vm33_vm1, %v21_v11  ;;  %p283_p4 = pnand %p282_p3, %p276_p0 }
  0xde   :  { %v103_v16 = vpop.f32.mrb[0].mxu0 }
  0xdf   :  { %v104_v17 = vadd.f32 %v219_v15, %v103_v16  ;;  %v243_v18 = vpop.f32.mrb[1].mxu0 }
  0xe1   :  { %v107_v19 = vmax.f32 %v104_v17, 0.0 }
  0xe3   :  { %253 = vmatmul.mubr.msk.f32.vlgmr.msra.gmra.mrb[0].mxu1 %vm33_vm1, %v107_v19 }
 0x1b6   :  { %v188_v21 = vpop.f32.mrb[0].mxu1 }
 0x1b7   :  { %v189_v22 = vadd.f32 %v221_v20, %v188_v21  ;;  %v254_v23 = vpop.f32.mrb[1].mxu1 }
 0x1b9   :  { %v193_v24 = vsel %vm192_vm2, %v189_v22, -inf }
 0x1ba   :  { %194 = vmax.xlane.f32.xlu0 %v193_v24 }
 0x247   :  { %v195_v25 = vpop.xlane.xlu0 %194 }
 0x248   :  { %v196_v26 = vsub.f32 %v189_v22, %v195_v25 }
 0x24a   :  { %v197_v27 = vmul.f32 1.442695, %v196_v26 }
 0x24c   :  { %271 = vpow2.f32 %v197_v27 }
 0x256   :  { %v272_v28 = vpop.eup %271 }
 0x257   :  { %v199_v29 = vsel %vm192_vm2, %v272_v28, 0.0 }
 0x258   :  { %200 = vadd.xlane.f32.xlu0 %v199_v29 }
 0x2e5   :  { %v201_v30 = vpop.xlane.xlu0 %200 }
 0x2e6   :  { %273 = vrcp.f32 %v201_v30 }
 0x2f0   :  { %v274_v31 = vpop.eup %273 }
 0x2f1   :  { %v203_v32 = vmul.f32 %v274_v31, %v272_v28 }
 0x2f3   :  { %204 = vst.msk [vmem:[#allocation2] sm:$0xff] %vm192_vm2, %v203_v32 }
 0x2f4   :  { %286 = shalt.err (!%p283_p4)
}
 0x2f5   :  { %s287_s15 = scalar_lea.hbm %s386_s5, 128 }
 0x2f6   :  { %p288_p5 = scmp.ne.s32.totalorder %s386_s5, %s287_s15  ;;  %p291_p6 = scmp.lt.u32.totalorder %s287_s15, %s386_s5 }
 0x2f8   :  { %p293_p7 = pnand %p291_p6, %p288_p5 }
 0x2fa   :  { %296 = shalt.err (!%p293_p7)
}
 0x2fb   :  { %214 = dma.vmem_to_hbm [thread:$0]  %s212_s3, 128, %s386_s5, [#allocation3]  }
 0x2fc   :  { %297 = dma.done.wait [#allocation3], 128  }
 0x2fd   :  { %298 = vsyncadd [#allocation3], 4294967168 }
 0x2fe   :  { %218 = vsyncpa [#allocation3], 1 }

</bundles_post_ra>
